<compile_context>
chip_gen: v6e
topology: v6e:2x2x1
jax: 0.10.0
libtpu: 0.0.40
codegen_flags: <defaults>
</compile_context>

<pallas_src>
import math
import functools

import jax
import jax.numpy as jnp
import numpy as np
from jax.experimental import pallas as pl
from jax.experimental.pallas import tpu as pltpu


# Rows of the packed bias/constant slab.
_BQ, _BK, _BV, _BO, _LNG, _LNB, _MASK0 = 0, 1, 2, 3, 4, 5, 6


def _two_way_kernel(x_ref, w_ref, b_ref, o_ref, *, num_heads):
    """x_ref: (N, L, C) input exactly as the caller holds it.
    w_ref: (6, C, C) = [Wq_bd*s, Wk_bd, Wv_bd, Wo_bd, M_mean, W12 + I]  (all
    per-half weights embedded block-diagonally; query scale & FFN residual
    folded in).  b_ref: (6 + 2H, C) = [bq*s, bk, bv, bo, ln_g, ln_b,
    (half,head) lane masks...] with every per-half row tiled to C lanes."""
    N, L, C = x_ref.shape
    R = N * L
    n_groups = 2 * num_heads            # (half, head) pairs

    x = x_ref[...]                      # (N, L, C)
    xf = x.reshape(R, C)                # leading-dim merge (free)
    b = b_ref[...]                      # (6 + 2H, C)

    # Fused projections: one matmul each covers both halves (block-diag weight).
    q = jnp.dot(xf, w_ref[0], preferred_element_type=jnp.float32) + b[_BQ:_BQ + 1]
    k = jnp.dot(xf, w_ref[1], preferred_element_type=jnp.float32) + b[_BK:_BK + 1]
    v = jnp.dot(xf, w_ref[2], preferred_element_type=jnp.float32) + b[_BV:_BV + 1]

    qb = q.reshape(N, L, C)
    kb = k.reshape(N, L, C)
    vb = v.reshape(N, L, C)

    # Multi-head, two-way attention without any lane slicing / concatenation:
    # each (half, head) group is selected with a lane mask (pure VPU).
    attn = jnp.zeros((N, L, C), jnp.float32)
    for g in range(n_groups):           # static, tiny group count
        mask = b[_MASK0 + g:_MASK0 + g + 1]              # (1, C)
        s = jnp.einsum('nle,nme->nlm', qb * mask, kb,
                       preferred_element_type=jnp.float32)   # (N, L, L)
        s = s - jnp.max(s, axis=-1, keepdims=True)
        p = jnp.exp(s)
        p = p * pl.reciprocal(jnp.sum(p, axis=-1, keepdims=True), approx=True)
        ctx = jnp.einsum('nlm,nme->nle', p, vb,
                         preferred_element_type=jnp.float32)  # (N, L, C)
        attn = attn + ctx * mask         # keep only this group's output lanes

    a = jnp.dot(attn.reshape(R, C), w_ref[3],
                preferred_element_type=jnp.float32) + b[_BO:_BO + 1]

    # Per-half LayerNorm (biased variance, eps=1e-5) via the block-diagonal
    # averaging matrix M_mean = blockdiag(ones(E,E)/E): no XLU lane reductions,
    # no lane<->sublane relayout.  Residual with the input.
    mu = jnp.dot(a, w_ref[4], preferred_element_type=jnp.float32)
    cen = a - mu
    var = jnp.dot(cen * cen, w_ref[4], preferred_element_type=jnp.float32)
    y = (cen * jax.lax.rsqrt(var + 1e-5) * b[_LNG:_LNG + 1]
         + b[_LNB:_LNB + 1] + xf)        # (R, C), already [half0 | half1] lanes

    # FFN with the residual folded into the weight: out = y @ (w1@w2 + I).
    out = jnp.dot(y, w_ref[5], preferred_element_type=jnp.float32)
    o_ref[...] = out.reshape(N, L, C).astype(o_ref.dtype)


def two_way_transformer_layer(x, params, num_heads):
    """x: (N, L, C) float32."""
    N, L, C = x.shape
    E = C // 2
    assert E % num_heads == 0
    head_dim = E // num_heads
    scale = 1.0 / math.sqrt(head_dim)
    p = params

    def bd(a):
        """Embed a per-half (E,E) weight block-diagonally into (C,C)."""
        return jnp.kron(jnp.eye(2, dtype=a.dtype), a)

    def two(row):
        """Tile a per-half (1,E) bias/affine row to (1,C)."""
        return jnp.concatenate([row, row], axis=-1)

    # ---- algebraic fusion of back-to-back linears (once, outside the kernel) ----
    wq_f = (p["wq"] @ p["wqi"]) * scale                  # query scale folded in
    wk_f = p["wk"] @ p["wki"]
    wv_f = p["wv"] @ p["wvi"]
    m_mean = bd(jnp.full((E, E), 1.0 / E, jnp.float32))  # per-half averaging
    w12p = p["w1"] @ p["w2"] + jnp.eye(C, dtype=jnp.float32)   # FFN residual folded
    w_slab = jnp.stack([bd(wq_f), bd(wk_f), bd(wv_f), bd(p["wo"]),
                        m_mean, w12p])                   # (6, C, C)

    # (half, head) lane masks: lane j belongs to group j // head_dim.
    lane_group = jnp.arange(C) // head_dim
    masks = (lane_group[None, :] ==
             jnp.arange(2 * num_heads)[:, None]).astype(jnp.float32)   # (2H, C)
    b_slab = jnp.concatenate(
        [two(p["bqi"] * scale), two(p["bki"]), two(p["bvi"]), two(p["bo"]),
         two(p["ln_g"]), two(p["ln_b"]), masks], axis=0)  # (6 + 2H, C)

    kernel = functools.partial(_two_way_kernel, num_heads=num_heads)

    # Single grid step: the whole layer is far below per-step grid overhead at
    # these sizes, and x / output stay in the caller's (N, L, C) layout.
    return pl.pallas_call(
        kernel,
        out_shape=jax.ShapeDtypeStruct((N, L, C), x.dtype),
        grid_spec=pltpu.PrefetchScalarGridSpec(
            num_scalar_prefetch=0,
            grid=(1,),
            in_specs=[
                pl.BlockSpec((N, L, C), lambda i: (0, 0, 0)),
                pl.BlockSpec(w_slab.shape, lambda i: (0, 0, 0)),
                pl.BlockSpec(b_slab.shape, lambda i: (0, 0)),
            ],
            out_specs=pl.BlockSpec((N, L, C), lambda i: (0, 0, 0)),
        ),
        compiler_params=pltpu.CompilerParams(
            dimension_semantics=("arbitrary",)),
    )(x, w_slab, b_slab)


def init_params(key, c):
    """Deterministic synthetic parameters (shapes match the PyTorch module)."""
    E = c // 2
    ks = jax.random.split(key, 16)

    def w(k, shape, fan_in):
        return jax.random.normal(k, shape, jnp.float32) / math.sqrt(fan_in)

    return {
        # q/k/v Linears (bias=False), pre-transposed to (in, out)
        "wq": w(ks[0], (E, E), E),
        "wk": w(ks[1], (E, E), E),
        "wv": w(ks[2], (E, E), E),
        # MultiheadAttention in_proj (weight + bias), per q/k/v chunk
        "wqi": w(ks[3], (E, E), E),
        "wki": w(ks[4], (E, E), E),
        "wvi": w(ks[5], (E, E), E),
        "bqi": 0.02 * jax.random.normal(ks[6], (1, E), jnp.float32),
        "bki": 0.02 * jax.random.normal(ks[7], (1, E), jnp.float32),
        "bvi": 0.02 * jax.random.normal(ks[8], (1, E), jnp.float32),
        # MultiheadAttention out_proj (weight + bias)
        "wo": w(ks[9], (E, E), E),
        "bo": 0.02 * jax.random.normal(ks[10], (1, E), jnp.float32),
        # LayerNorm affine params
        "ln_g": 1.0 + 0.1 * jax.random.normal(ks[11], (1, E), jnp.float32),
        "ln_b": 0.1 * jax.random.normal(ks[12], (1, E), jnp.float32),
        # fc1 / fc2 (bias=False), pre-transposed to (in, out)
        "w1": w(ks[13], (c, c), c),
        "w2": w(ks[14], (c, c), c),
    }


def reference_forward(x, p, num_heads):
    """Pure-JAX reference mirroring the PyTorch forward (unfused)."""
    E = x.shape[-1] // 2
    hd = E // num_heads
    scale = 1.0 / math.sqrt(hd)

    def half(xh):  # (L, E)
        q = xh @ p["wq"]
        k = xh @ p["wk"]
        v = xh @ p["wv"]
        q2 = (q @ p["wqi"] + p["bqi"][0]) * scale
        k2 = k @ p["wki"] + p["bki"][0]
        v2 = v @ p["wvi"] + p["bvi"][0]
        outs = []
        for h in range(num_heads):
            sl = slice(h * hd, (h + 1) * hd)
            s = q2[:, sl] @ k2[:, sl].T
            pr = jax.nn.softmax(s, axis=-1)
            outs.append(pr @ v2[:, sl])
        a = jnp.concatenate(outs, -1) @ p["wo"] + p["bo"][0]
        mu = a.mean(-1, keepdims=True)
        var = ((a - mu) ** 2).mean(-1, keepdims=True)
        ln = (a - mu) / jnp.sqrt(var + 1e-5) * p["ln_g"][0] + p["ln_b"][0]
        return ln + xh

    x1, x2 = x[..., :E], x[..., E:]
    y1 = jax.vmap(half)(x1)
    y2 = jax.vmap(half)(x2)
    xc = jnp.concatenate([y1, y2], -1)
    return (xc @ p["w1"]) @ p["w2"] + xc


if __name__ == "__main__":
    key = jax.random.PRNGKey(0)
    kx, kp = jax.random.split(key)

    N, L, C, NUM_HEADS = 2, 8, 32, 2          # batch, seq, channels (c=32 -> c//2=16)
    x = jax.random.normal(kx, (N, L, C), jnp.float32)
    params = init_params(kp, C)

    out = two_way_transformer_layer(x, params, NUM_HEADS)
    out = jax.block_until_ready(out)

    ref = reference_forward(x, params, NUM_HEADS)
    np.testing.assert_allclose(np.asarray(out), np.asarray(ref),
                               rtol=2e-2, atol=2e-2)
    print("KERNEL_OK")
</pallas_src>

<mosaic_0001>
module attributes {stable_mosaic.version = 11 : i64} {
  func.func @_two_way_kernel(%arg0: i32, %arg1: memref<2x8x32xf32, #tpu.memory_space<vmem>>, %arg2: memref<6x32x32xf32, #tpu.memory_space<vmem>>, %arg3: memref<10x32xf32, #tpu.memory_space<vmem>>, %arg4: memref<2x8x32xf32, #tpu.memory_space<vmem>>) attributes {dimension_semantics = [#tpu.dimension_semantics<arbitrary>], iteration_bounds = array<i64: 1>, scalar_prefetch = 0 : i64, scratch_operands = 0 : i64, tpu.core_type = #tpu.core_type<tc>, window_params = [{pipeline_mode = #tpu.pipeline_mode<synchronous>, transform_indices = @transform_0, window_bounds = array<i64: 2, 8, 32>}, {pipeline_mode = #tpu.pipeline_mode<synchronous>, transform_indices = @transform_1, window_bounds = array<i64: 6, 32, 32>}, {pipeline_mode = #tpu.pipeline_mode<synchronous>, transform_indices = @transform_2, window_bounds = array<i64: 10, 32>}, {pipeline_mode = #tpu.pipeline_mode<synchronous>, transform_indices = @transform_3, window_bounds = array<i64: 2, 8, 32>}]} {
    %c0 = arith.constant 0 : index
    %c0_0 = arith.constant 0 : index
    %c0_1 = arith.constant 0 : index
    %0 = vector.load %arg1[%c0, %c0_0, %c0_1] : memref<2x8x32xf32, #tpu.memory_space<vmem>>, vector<2x8x32xf32>
    %1 = vector.shape_cast %0 : vector<2x8x32xf32> to vector<16x32xf32>
    %c0_2 = arith.constant 0 : index
    %c0_3 = arith.constant 0 : index
    %2 = vector.load %arg3[%c0_2, %c0_3] : memref<10x32xf32, #tpu.memory_space<vmem>>, vector<10x32xf32>
    %c0_4 = arith.constant 0 : index
    %c0_5 = arith.constant 0 : index
    %c0_6 = arith.constant 0 : index
    %3 = vector.load %arg2[%c0_4, %c0_5, %c0_6] : memref<6x32x32xf32, #tpu.memory_space<vmem>>, vector<1x32x32xf32>
    %4 = vector.shape_cast %3 : vector<1x32x32xf32> to vector<32x32xf32>
    %cst = arith.constant dense<0.000000e+00> : vector<16x32xf32>
    %5 = tpu.matmul %1, %4, %cst {dimension_numbers = #tpu.dot_dimension_numbers<[1], [0], [0], [1], [0, 0, 1, 1], [], []>} : vector<16x32xf32>, vector<32x32xf32>, vector<16x32xf32> -> vector<16x32xf32>
    %6 = vector.extract_strided_slice %2 {offsets = [0, 0], sizes = [1, 32], strides = [1, 1]} : vector<10x32xf32> to vector<1x32xf32>
    %7 = vector.broadcast %6 : vector<1x32xf32> to vector<16x32xf32>
    %8 = arith.addf %5, %7 : vector<16x32xf32>
    %c1 = arith.constant 1 : index
    %c0_7 = arith.constant 0 : index
    %c0_8 = arith.constant 0 : index
    %9 = vector.load %arg2[%c1, %c0_7, %c0_8] : memref<6x32x32xf32, #tpu.memory_space<vmem>>, vector<1x32x32xf32>
    %10 = vector.shape_cast %9 : vector<1x32x32xf32> to vector<32x32xf32>
    %cst_9 = arith.constant dense<0.000000e+00> : vector<16x32xf32>
    %11 = tpu.matmul %1, %10, %cst_9 {dimension_numbers = #tpu.dot_dimension_numbers<[1], [0], [0], [1], [0, 0, 1, 1], [], []>} : vector<16x32xf32>, vector<32x32xf32>, vector<16x32xf32> -> vector<16x32xf32>
    %12 = vector.extract_strided_slice %2 {offsets = [1, 0], sizes = [1, 32], strides = [1, 1]} : vector<10x32xf32> to vector<1x32xf32>
    %13 = vector.broadcast %12 : vector<1x32xf32> to vector<16x32xf32>
    %14 = arith.addf %11, %13 : vector<16x32xf32>
    %c2 = arith.constant 2 : index
    %c0_10 = arith.constant 0 : index
    %c0_11 = arith.constant 0 : index
    %15 = vector.load %arg2[%c2, %c0_10, %c0_11] : memref<6x32x32xf32, #tpu.memory_space<vmem>>, vector<1x32x32xf32>
    %16 = vector.shape_cast %15 : vector<1x32x32xf32> to vector<32x32xf32>
    %cst_12 = arith.constant dense<0.000000e+00> : vector<16x32xf32>
    %17 = tpu.matmul %1, %16, %cst_12 {dimension_numbers = #tpu.dot_dimension_numbers<[1], [0], [0], [1], [0, 0, 1, 1], [], []>} : vector<16x32xf32>, vector<32x32xf32>, vector<16x32xf32> -> vector<16x32xf32>
    %18 = vector.extract_strided_slice %2 {offsets = [2, 0], sizes = [1, 32], strides = [1, 1]} : vector<10x32xf32> to vector<1x32xf32>
    %19 = vector.broadcast %18 : vector<1x32xf32> to vector<16x32xf32>
    %20 = arith.addf %17, %19 : vector<16x32xf32>
    %21 = vector.shape_cast %8 : vector<16x32xf32> to vector<2x8x32xf32>
    %22 = vector.shape_cast %14 : vector<16x32xf32> to vector<2x8x32xf32>
    %23 = vector.shape_cast %20 : vector<16x32xf32> to vector<2x8x32xf32>
    %cst_13 = arith.constant 0.000000e+00 : f32
    %24 = vector.broadcast %cst_13 : f32 to vector<2x8x32xf32>
    %25 = vector.extract_strided_slice %2 {offsets = [6, 0], sizes = [1, 32], strides = [1, 1]} : vector<10x32xf32> to vector<1x32xf32>
    %26 = vector.shape_cast %25 : vector<1x32xf32> to vector<1x1x32xf32>
    %27 = vector.broadcast %26 : vector<1x1x32xf32> to vector<2x8x32xf32>
    %28 = arith.mulf %21, %27 : vector<2x8x32xf32>
    "tpu.trace_start"() <{level = 10 : i32, message = "nle,nme->nlm"}> : () -> ()
    %cst_14 = arith.constant dense<0.000000e+00> : vector<2x8x8xf32>
    %29 = tpu.matmul %28, %22, %cst_14 {dimension_numbers = #tpu.dot_dimension_numbers<[2], [2], [1], [1], [0, 0, 0, 1, 1, 1], [0], [0]>} : vector<2x8x32xf32>, vector<2x8x32xf32>, vector<2x8x8xf32> -> vector<2x8x8xf32>
    "tpu.trace_stop"() : () -> ()
    %cst_15 = arith.constant dense<0xFF800000> : vector<2x8xf32>
    %30 = vector.multi_reduction <maximumf>, %29, %cst_15 [2] : vector<2x8x8xf32> to vector<2x8xf32>
    %31 = vector.shape_cast %30 : vector<2x8xf32> to vector<2x8x1xf32>
    %32 = vector.broadcast %31 : vector<2x8x1xf32> to vector<2x8x8xf32>
    %33 = arith.subf %29, %32 : vector<2x8x8xf32>
    %34 = math.exp %33 : vector<2x8x8xf32>
    %cst_16 = arith.constant dense<0.000000e+00> : vector<2x8xf32>
    %35 = vector.multi_reduction <add>, %34, %cst_16 [2] : vector<2x8x8xf32> to vector<2x8xf32>
    %36 = vector.shape_cast %35 : vector<2x8xf32> to vector<2x8x1xf32>
    %37 = tpu.reciprocal %36 {approx = true} : vector<2x8x1xf32> -> vector<2x8x1xf32>
    %38 = vector.broadcast %37 : vector<2x8x1xf32> to vector<2x8x8xf32>
    %39 = arith.mulf %34, %38 : vector<2x8x8xf32>
    "tpu.trace_start"() <{level = 10 : i32, message = "nlm,nme->nle"}> : () -> ()
    %cst_17 = arith.constant dense<0.000000e+00> : vector<2x8x32xf32>
    %40 = tpu.matmul %39, %23, %cst_17 {dimension_numbers = #tpu.dot_dimension_numbers<[2], [1], [1], [2], [0, 0, 0, 1, 1, 2], [0], [0]>} : vector<2x8x8xf32>, vector<2x8x32xf32>, vector<2x8x32xf32> -> vector<2x8x32xf32>
    "tpu.trace_stop"() : () -> ()
    %41 = vector.shape_cast %25 : vector<1x32xf32> to vector<1x1x32xf32>
    %42 = vector.broadcast %41 : vector<1x1x32xf32> to vector<2x8x32xf32>
    %43 = arith.mulf %40, %42 : vector<2x8x32xf32>
    %44 = arith.addf %24, %43 : vector<2x8x32xf32>
    %45 = vector.extract_strided_slice %2 {offsets = [7, 0], sizes = [1, 32], strides = [1, 1]} : vector<10x32xf32> to vector<1x32xf32>
    %46 = vector.shape_cast %45 : vector<1x32xf32> to vector<1x1x32xf32>
    %47 = vector.broadcast %46 : vector<1x1x32xf32> to vector<2x8x32xf32>
    %48 = arith.mulf %21, %47 : vector<2x8x32xf32>
    "tpu.trace_start"() <{level = 10 : i32, message = "nle,nme->nlm"}> : () -> ()
    %cst_18 = arith.constant dense<0.000000e+00> : vector<2x8x8xf32>
    %49 = tpu.matmul %48, %22, %cst_18 {dimension_numbers = #tpu.dot_dimension_numbers<[2], [2], [1], [1], [0, 0, 0, 1, 1, 1], [0], [0]>} : vector<2x8x32xf32>, vector<2x8x32xf32>, vector<2x8x8xf32> -> vector<2x8x8xf32>
    "tpu.trace_stop"() : () -> ()
    %cst_19 = arith.constant dense<0xFF800000> : vector<2x8xf32>
    %50 = vector.multi_reduction <maximumf>, %49, %cst_19 [2] : vector<2x8x8xf32> to vector<2x8xf32>
    %51 = vector.shape_cast %50 : vector<2x8xf32> to vector<2x8x1xf32>
    %52 = vector.broadcast %51 : vector<2x8x1xf32> to vector<2x8x8xf32>
    %53 = arith.subf %49, %52 : vector<2x8x8xf32>
    %54 = math.exp %53 : vector<2x8x8xf32>
    %cst_20 = arith.constant dense<0.000000e+00> : vector<2x8xf32>
    %55 = vector.multi_reduction <add>, %54, %cst_20 [2] : vector<2x8x8xf32> to vector<2x8xf32>
    %56 = vector.shape_cast %55 : vector<2x8xf32> to vector<2x8x1xf32>
    %57 = tpu.reciprocal %56 {approx = true} : vector<2x8x1xf32> -> vector<2x8x1xf32>
    %58 = vector.broadcast %57 : vector<2x8x1xf32> to vector<2x8x8xf32>
    %59 = arith.mulf %54, %58 : vector<2x8x8xf32>
    "tpu.trace_start"() <{level = 10 : i32, message = "nlm,nme->nle"}> : () -> ()
    %cst_21 = arith.constant dense<0.000000e+00> : vector<2x8x32xf32>
    %60 = tpu.matmul %59, %23, %cst_21 {dimension_numbers = #tpu.dot_dimension_numbers<[2], [1], [1], [2], [0, 0, 0, 1, 1, 2], [0], [0]>} : vector<2x8x8xf32>, vector<2x8x32xf32>, vector<2x8x32xf32> -> vector<2x8x32xf32>
    "tpu.trace_stop"() : () -> ()
    %61 = vector.shape_cast %45 : vector<1x32xf32> to vector<1x1x32xf32>
    %62 = vector.broadcast %61 : vector<1x1x32xf32> to vector<2x8x32xf32>
    %63 = arith.mulf %60, %62 : vector<2x8x32xf32>
    %64 = arith.addf %44, %63 : vector<2x8x32xf32>
    %65 = vector.extract_strided_slice %2 {offsets = [8, 0], sizes = [1, 32], strides = [1, 1]} : vector<10x32xf32> to vector<1x32xf32>
    %66 = vector.shape_cast %65 : vector<1x32xf32> to vector<1x1x32xf32>
    %67 = vector.broadcast %66 : vector<1x1x32xf32> to vector<2x8x32xf32>
    %68 = arith.mulf %21, %67 : vector<2x8x32xf32>
    "tpu.trace_start"() <{level = 10 : i32, message = "nle,nme->nlm"}> : () -> ()
    %cst_22 = arith.constant dense<0.000000e+00> : vector<2x8x8xf32>
    %69 = tpu.matmul %68, %22, %cst_22 {dimension_numbers = #tpu.dot_dimension_numbers<[2], [2], [1], [1], [0, 0, 0, 1, 1, 1], [0], [0]>} : vector<2x8x32xf32>, vector<2x8x32xf32>, vector<2x8x8xf32> -> vector<2x8x8xf32>
    "tpu.trace_stop"() : () -> ()
    %cst_23 = arith.constant dense<0xFF800000> : vector<2x8xf32>
    %70 = vector.multi_reduction <maximumf>, %69, %cst_23 [2] : vector<2x8x8xf32> to vector<2x8xf32>
    %71 = vector.shape_cast %70 : vector<2x8xf32> to vector<2x8x1xf32>
    %72 = vector.broadcast %71 : vector<2x8x1xf32> to vector<2x8x8xf32>
    %73 = arith.subf %69, %72 : vector<2x8x8xf32>
    %74 = math.exp %73 : vector<2x8x8xf32>
    %cst_24 = arith.constant dense<0.000000e+00> : vector<2x8xf32>
    %75 = vector.multi_reduction <add>, %74, %cst_24 [2] : vector<2x8x8xf32> to vector<2x8xf32>
    %76 = vector.shape_cast %75 : vector<2x8xf32> to vector<2x8x1xf32>
    %77 = tpu.reciprocal %76 {approx = true} : vector<2x8x1xf32> -> vector<2x8x1xf32>
    %78 = vector.broadcast %77 : vector<2x8x1xf32> to vector<2x8x8xf32>
    %79 = arith.mulf %74, %78 : vector<2x8x8xf32>
    "tpu.trace_start"() <{level = 10 : i32, message = "nlm,nme->nle"}> : () -> ()
    %cst_25 = arith.constant dense<0.000000e+00> : vector<2x8x32xf32>
    %80 = tpu.matmul %79, %23, %cst_25 {dimension_numbers = #tpu.dot_dimension_numbers<[2], [1], [1], [2], [0, 0, 0, 1, 1, 2], [0], [0]>} : vector<2x8x8xf32>, vector<2x8x32xf32>, vector<2x8x32xf32> -> vector<2x8x32xf32>
    "tpu.trace_stop"() : () -> ()
    %81 = vector.shape_cast %65 : vector<1x32xf32> to vector<1x1x32xf32>
    %82 = vector.broadcast %81 : vector<1x1x32xf32> to vector<2x8x32xf32>
    %83 = arith.mulf %80, %82 : vector<2x8x32xf32>
    %84 = arith.addf %64, %83 : vector<2x8x32xf32>
    %85 = vector.extract_strided_slice %2 {offsets = [9, 0], sizes = [1, 32], strides = [1, 1]} : vector<10x32xf32> to vector<1x32xf32>
    %86 = vector.shape_cast %85 : vector<1x32xf32> to vector<1x1x32xf32>
    %87 = vector.broadcast %86 : vector<1x1x32xf32> to vector<2x8x32xf32>
    %88 = arith.mulf %21, %87 : vector<2x8x32xf32>
    "tpu.trace_start"() <{level = 10 : i32, message = "nle,nme->nlm"}> : () -> ()
    %cst_26 = arith.constant dense<0.000000e+00> : vector<2x8x8xf32>
    %89 = tpu.matmul %88, %22, %cst_26 {dimension_numbers = #tpu.dot_dimension_numbers<[2], [2], [1], [1], [0, 0, 0, 1, 1, 1], [0], [0]>} : vector<2x8x32xf32>, vector<2x8x32xf32>, vector<2x8x8xf32> -> vector<2x8x8xf32>
    "tpu.trace_stop"() : () -> ()
    %cst_27 = arith.constant dense<0xFF800000> : vector<2x8xf32>
    %90 = vector.multi_reduction <maximumf>, %89, %cst_27 [2] : vector<2x8x8xf32> to vector<2x8xf32>
    %91 = vector.shape_cast %90 : vector<2x8xf32> to vector<2x8x1xf32>
    %92 = vector.broadcast %91 : vector<2x8x1xf32> to vector<2x8x8xf32>
    %93 = arith.subf %89, %92 : vector<2x8x8xf32>
    %94 = math.exp %93 : vector<2x8x8xf32>
    %cst_28 = arith.constant dense<0.000000e+00> : vector<2x8xf32>
    %95 = vector.multi_reduction <add>, %94, %cst_28 [2] : vector<2x8x8xf32> to vector<2x8xf32>
    %96 = vector.shape_cast %95 : vector<2x8xf32> to vector<2x8x1xf32>
    %97 = tpu.reciprocal %96 {approx = true} : vector<2x8x1xf32> -> vector<2x8x1xf32>
    %98 = vector.broadcast %97 : vector<2x8x1xf32> to vector<2x8x8xf32>
    %99 = arith.mulf %94, %98 : vector<2x8x8xf32>
    "tpu.trace_start"() <{level = 10 : i32, message = "nlm,nme->nle"}> : () -> ()
    %cst_29 = arith.constant dense<0.000000e+00> : vector<2x8x32xf32>
    %100 = tpu.matmul %99, %23, %cst_29 {dimension_numbers = #tpu.dot_dimension_numbers<[2], [1], [1], [2], [0, 0, 0, 1, 1, 2], [0], [0]>} : vector<2x8x8xf32>, vector<2x8x32xf32>, vector<2x8x32xf32> -> vector<2x8x32xf32>
    "tpu.trace_stop"() : () -> ()
    %101 = vector.shape_cast %85 : vector<1x32xf32> to vector<1x1x32xf32>
    %102 = vector.broadcast %101 : vector<1x1x32xf32> to vector<2x8x32xf32>
    %103 = arith.mulf %100, %102 : vector<2x8x32xf32>
    %104 = arith.addf %84, %103 : vector<2x8x32xf32>
    %105 = vector.shape_cast %104 : vector<2x8x32xf32> to vector<16x32xf32>
    %c3 = arith.constant 3 : index
    %c0_30 = arith.constant 0 : index
    %c0_31 = arith.constant 0 : index
    %106 = vector.load %arg2[%c3, %c0_30, %c0_31] : memref<6x32x32xf32, #tpu.memory_space<vmem>>, vector<1x32x32xf32>
    %107 = vector.shape_cast %106 : vector<1x32x32xf32> to vector<32x32xf32>
    %cst_32 = arith.constant dense<0.000000e+00> : vector<16x32xf32>
    %108 = tpu.matmul %105, %107, %cst_32 {dimension_numbers = #tpu.dot_dimension_numbers<[1], [0], [0], [1], [0, 0, 1, 1], [], []>} : vector<16x32xf32>, vector<32x32xf32>, vector<16x32xf32> -> vector<16x32xf32>
    %109 = vector.extract_strided_slice %2 {offsets = [3, 0], sizes = [1, 32], strides = [1, 1]} : vector<10x32xf32> to vector<1x32xf32>
    %110 = vector.broadcast %109 : vector<1x32xf32> to vector<16x32xf32>
    %111 = arith.addf %108, %110 : vector<16x32xf32>
    %c4 = arith.constant 4 : index
    %c0_33 = arith.constant 0 : index
    %c0_34 = arith.constant 0 : index
    %112 = vector.load %arg2[%c4, %c0_33, %c0_34] : memref<6x32x32xf32, #tpu.memory_space<vmem>>, vector<1x32x32xf32>
    %113 = vector.shape_cast %112 : vector<1x32x32xf32> to vector<32x32xf32>
    %cst_35 = arith.constant dense<0.000000e+00> : vector<16x32xf32>
    %114 = tpu.matmul %111, %113, %cst_35 {dimension_numbers = #tpu.dot_dimension_numbers<[1], [0], [0], [1], [0, 0, 1, 1], [], []>} : vector<16x32xf32>, vector<32x32xf32>, vector<16x32xf32> -> vector<16x32xf32>
    %115 = arith.subf %111, %114 : vector<16x32xf32>
    %116 = arith.mulf %115, %115 : vector<16x32xf32>
    %c4_36 = arith.constant 4 : index
    %c0_37 = arith.constant 0 : index
    %c0_38 = arith.constant 0 : index
    %117 = vector.load %arg2[%c4_36, %c0_37, %c0_38] : memref<6x32x32xf32, #tpu.memory_space<vmem>>, vector<1x32x32xf32>
    %118 = vector.shape_cast %117 : vector<1x32x32xf32> to vector<32x32xf32>
    %cst_39 = arith.constant dense<0.000000e+00> : vector<16x32xf32>
    %119 = tpu.matmul %116, %118, %cst_39 {dimension_numbers = #tpu.dot_dimension_numbers<[1], [0], [0], [1], [0, 0, 1, 1], [], []>} : vector<16x32xf32>, vector<32x32xf32>, vector<16x32xf32> -> vector<16x32xf32>
    %cst_40 = arith.constant 9.99999974E-6 : f32
    %120 = vector.broadcast %cst_40 : f32 to vector<16x32xf32>
    %121 = arith.addf %119, %120 : vector<16x32xf32>
    %122 = math.rsqrt %121 : vector<16x32xf32>
    %123 = arith.mulf %115, %122 : vector<16x32xf32>
    %124 = vector.extract_strided_slice %2 {offsets = [4, 0], sizes = [1, 32], strides = [1, 1]} : vector<10x32xf32> to vector<1x32xf32>
    %125 = vector.broadcast %124 : vector<1x32xf32> to vector<16x32xf32>
    %126 = arith.mulf %123, %125 : vector<16x32xf32>
    %127 = vector.extract_strided_slice %2 {offsets = [5, 0], sizes = [1, 32], strides = [1, 1]} : vector<10x32xf32> to vector<1x32xf32>
    %128 = vector.broadcast %127 : vector<1x32xf32> to vector<16x32xf32>
    %129 = arith.addf %126, %128 : vector<16x32xf32>
    %130 = arith.addf %129, %1 : vector<16x32xf32>
    %c5 = arith.constant 5 : index
    %c0_41 = arith.constant 0 : index
    %c0_42 = arith.constant 0 : index
    %131 = vector.load %arg2[%c5, %c0_41, %c0_42] : memref<6x32x32xf32, #tpu.memory_space<vmem>>, vector<1x32x32xf32>
    %132 = vector.shape_cast %131 : vector<1x32x32xf32> to vector<32x32xf32>
    %cst_43 = arith.constant dense<0.000000e+00> : vector<16x32xf32>
    %133 = tpu.matmul %130, %132, %cst_43 {dimension_numbers = #tpu.dot_dimension_numbers<[1], [0], [0], [1], [0, 0, 1, 1], [], []>} : vector<16x32xf32>, vector<32x32xf32>, vector<16x32xf32> -> vector<16x32xf32>
    %134 = vector.shape_cast %133 : vector<16x32xf32> to vector<2x8x32xf32>
    %c0_44 = arith.constant 0 : index
    %c0_45 = arith.constant 0 : index
    %c0_46 = arith.constant 0 : index
    %135 = vector.load %arg4[%c0_44, %c0_45, %c0_46] : memref<2x8x32xf32, #tpu.memory_space<vmem>>, vector<2x8x32xf32>
    tpu.vector_store %arg4[%c0_44, %c0_45, %c0_46], %134 {strides = array<i32>} : memref<2x8x32xf32, #tpu.memory_space<vmem>>, vector<2x8x32xf32>,
    return
  }
  func.func @transform_0(%arg0: i32) -> (i32, i32, i32) {
    %c0_i32 = arith.constant 0 : i32
    %c0_i32_0 = arith.constant 0 : i32
    %c0_i32_1 = arith.constant 0 : i32
    %c0_i32_2 = arith.constant 0 : i32
    return %c0_i32, %c0_i32_0, %c0_i32_1 : i32, i32, i32
  }
  func.func @transform_1(%arg0: i32) -> (i32, i32, i32) {
    %c0_i32 = arith.constant 0 : i32
    %c0_i32_0 = arith.constant 0 : i32
    %c0_i32_1 = arith.constant 0 : i32
    %c0_i32_2 = arith.constant 0 : i32
    return %c0_i32, %c0_i32_0, %c0_i32_1 : i32, i32, i32
  }
  func.func @transform_2(%arg0: i32) -> (i32, i32) {
    %c0_i32 = arith.constant 0 : i32
    %c0_i32_0 = arith.constant 0 : i32
    %c0_i32_1 = arith.constant 0 : i32
    return %c0_i32, %c0_i32_0 : i32, i32
  }
  func.func @transform_3(%arg0: i32) -> (i32, i32, i32) {
    %c0_i32 = arith.constant 0 : i32
    %c0_i32_0 = arith.constant 0 : i32
    %c0_i32_1 = arith.constant 0 : i32
    %c0_i32_2 = arith.constant 0 : i32
    return %c0_i32, %c0_i32_0, %c0_i32_1 : i32, i32, i32
  }
}

</mosaic_0001>

<bundles_post_ra>
// kernel: tpu_custom_call.1
= control target key start
LH: loop header
LB: loop body
LE: loop exit
PB: predicated region body
PF: predicated region fallthrough
CT: control target
= control target key end

     0   :  { %8 = vsyncpa [#allocation3], 0  ;;  %s2661_s0 = inlined_call_operand.hbm [shape: f32[2,8,32], index: 0, kind: input, shape index: {}]   ;;  %s2662_s1 = inlined_call_operand.hbm [shape: f32[6,32,32], index: 1, kind: input, shape index: {}]   ;;  %s2663_s2 = inlined_call_operand.hbm [shape: f32[10,32], index: 2, kind: input, shape index: {}]   ;;  %s2664_s3 = inlined_call_operand.hbm [shape: f32[2,8,32], index: 3, kind: output, shape index: {}]  }
   0x1   :  { %9 = vsyncpa [#allocation6], 0 }
   0x2   :  { %10 = vsyncpa [#allocation4], 0  ;;  %s2405_s12 = smov [#allocation5]   ;;  %s2406_s14 = smov [#allocation2]  }
   0x3   :  { %s28_s13 = sshll.u32 %s2405_s12, 4  ;;  %s16_s15 = sshll.u32 %s2406_s14, 4  ;;  %s29_s13 = int_to_ptr.vmem [resolvable:$true] %s28_s13  ;;  %s17_s15 = int_to_ptr.vmem [resolvable:$true] %s16_s15 }
   0x4   :  { %s2327_s16 = scalar_lea.vmem %s29_s13, 3072  ;;  %p2332_p1 = scmp.lt.s32.totalorder %s29_s13, %s29_s13 }
   0x5   :  { %p2328_p0 = scmp.ne.s32.totalorder %s29_s13, %s2327_s16  ;;  %p2333_p2 = scmp.lt.s32.totalorder %s2327_s16, %s2327_s16 }
   0x7   :  { %p2334_p3 = por %p2333_p2, %p2332_p1 }
   0x9   :  { %p2335_p4 = pnand %p2334_p3, %p2328_p0 }
   0xb   :  { %2338 = shalt.err (!%p2335_p4)
}
   0xc   :  { %s2407_s17 = smov 128   ;;  %s2408_s18 = smov 8  }
   0xd   :  { %34 = dma.hbm_to_vmem [thread:$0]  %s2662_s1, 3072, %s29_s13, [#allocation6], %s2407_s17, %s2407_s17, %s2408_s18  }
   0xe   :  { %s2347_s21 = scalar_lea.vmem %s17_s15, 256  ;;  %p2352_p6 = scmp.lt.s32.totalorder %s17_s15, %s17_s15 }
   0xf   :  { %p2348_p5 = scmp.ne.s32.totalorder %s17_s15, %s2347_s21  ;;  %p2353_p7 = scmp.lt.s32.totalorder %s2347_s21, %s2347_s21 }
  0x11   :  { %p2354_p8 = por %p2353_p7, %p2352_p6 }
  0x13   :  { %p2355_p9 = pnand %p2354_p8, %p2348_p5 }
  0x15   :  { %2358 = shalt.err (!%p2355_p9)
}
  0x16   :  { %22 = dma.hbm_to_vmem [thread:$0]  %s2661_s0, 256, %s17_s15, [#allocation3], %s2407_s17, %s2407_s17, %s2408_s18  }
  0x17   :  { %s2409_s24 = smov [#allocation7]  }
  0x18   :  { %s40_s25 = sshll.u32 %s2409_s24, 4  ;;  %s41_s25 = int_to_ptr.vmem [resolvable:$true] %s40_s25 }
  0x19   :  { %s2367_s26 = scalar_lea.vmem %s41_s25, 256  ;;  %p2372_p11 = scmp.lt.s32.totalorder %s41_s25, %s41_s25 }
  0x1a   :  { %p2368_p10 = scmp.ne.s32.totalorder %s41_s25, %s2367_s26  ;;  %p2373_p12 = scmp.lt.s32.totalorder %s2367_s26, %s2367_s26 }
  0x1c   :  { %p2374_p13 = por %p2373_p12, %p2372_p11 }
  0x1e   :  { %p2375_p0 = pnand %p2374_p13, %p2368_p10 }
  0x20   :  { %2378 = shalt.err (!%p2375_p0)
}
  0x21   :  { %46 = dma.hbm_to_vmem [thread:$0]  %s2663_s2, 256, %s41_s25, [#allocation6], %s2407_s17, %s2407_s17, %s2408_s18  }
  0x22   :  { %2399 = dma.done.wait [#allocation3], 256  }
  0x23   :  { %2400 = vsyncadd [#allocation3], 4294967040 }
  0x24   :  { %2401 = dma.done.wait [#allocation6], 3328  }
  0x25   :  { %2402 = vsyncadd [#allocation6], 4294963968  ;;  %v63_v0 = vld [vmem:[#allocation5 + $0x18] sm:$0xff]  ;;  %v62_v2 = vld [vmem:[#allocation5 + $0x10] sm:$0xff]  ;;  %vm68_vm0 = vcmask 261120   ;;  %v64_v10 = vlaneseq  ;;  %v2410_v15 = vmov 0.0  }
  0x26   :  { %v154_v1 = vld [vmem:[#allocation5 + $0x38] sm:$0xff]  ;;  %2118 = vmatprep.subr.mxu0 %v63_v0  ;;  %v153_v3 = vld [vmem:[#allocation5 + $0x30] sm:$0xff]  ;;  %v61_v4 = vld [vmem:[#allocation5 + $0x8] sm:$0xff]  ;;  %vm2411_vm1 = vmmov 0   ;;  %vm476_vm2 = vcmask 64512   ;;  %s2412_s0 = smov [#allocation8]  }
  0x27   :  { %2129 = vmatprep.subr.mxu1 %v154_v1  ;;  %2119 = vmatpush3.msra.mxu0 %v63_v0  ;;  %v152_v5 = vld [vmem:[#allocation5 + $0x28] sm:$0xff]  ;;  %v60_v6 = vld [vmem:[#allocation5] sm:$0xff]  ;;  %v2451_v8 = vld [vmem:[#allocation2] sm:$0xff]  ;;  %v2465_v11 = vshrl.u32 %v64_v10, 7  ;;  %s1993_s2 = sshll.u32 %s2412_s0, 4  ;;  %s1994_s2 = int_to_ptr.vmem [resolvable:$true] %s1993_s2 }
  0x28   :  { %2130 = vmatpush3.msra.mxu1 %v154_v1  ;;  %2120 = vmatprep.subr.mxu0 %v62_v2  ;;  %v151_v7 = vld [vmem:[#allocation5 + $0x20] sm:$0xff]  ;;  %v2453_v9 = vld [vmem:[#allocation2 + $0x8] sm:$0xff]  ;;  %v2467_v12 = vld [vmem:[#allocation7 + $0x8] sm:$0x3]  ;;  %s2379_s28 = scalar_lea.vmem %s1994_s2, 256  ;;  %p2384_p2 = scmp.lt.s32.totalorder %s1994_s2, %s1994_s2 }
  0x29   :  { %2131 = vmatprep.subr.mxu1 %v153_v3  ;;  %2121 = vmatpush3.msra.mxu0 %v62_v2  ;;  %v157_v13 = vsub.s32 1, %v2465_v11  ;;  %v66_v16 = vsub.s32 0, %v2465_v11  ;;  %v2477_v17 = vld [vmem:[#allocation7] sm:$0xff]  ;;  %v320_v18 = vsub.s32 6, %v2465_v11  ;;  %v238_v32 = vld [vmem:[#allocation5 + $0x58] sm:$0xff]  ;;  %v237_v33 = vld [vmem:[#allocation5 + $0x50] sm:$0xff]  ;;  %p2380_p1 = scmp.ne.s32.totalorder %s1994_s2, %s2379_s28  ;;  %p2385_p3 = scmp.lt.s32.totalorder %s2379_s28, %s2379_s28 }
  0x2a   :  { %2132 = vmatpush3.msra.mxu1 %v153_v3  ;;  %2122 = vmatprep.subr.mxu0 %v61_v4  ;;  %v236_v34 = vld [vmem:[#allocation5 + $0x48] sm:$0xff]  ;;  %v235_v35 = vld [vmem:[#allocation5 + $0x40] sm:$0xff]  ;;  %v241_v52 = vsub.s32 2, %v2465_v11  ;;  %v651_v60 = vsub.s32 7, %v2465_v11 }
  0x2b   :  { %2133 = vmatprep.subr.mxu1 %v152_v5  ;;  %2123 = vmatpush3.msra.mxu0 %v61_v4  ;;  %v2471_v14 = vrot.slane %v2467_v12, %v157_v13  ;;  %v67_v19 = vrot.slane %v2477_v17, %v66_v16  ;;  %v2484_v22 = vrot.slane %v2477_v17, %v320_v18  ;;  %p2386_p4 = por %p2385_p3, %p2384_p2 }
  0x2c   :  { %2134 = vmatpush3.msra.mxu1 %v152_v5  ;;  %2124 = vmatprep.subr.mxu0 %v60_v6  ;;  %v158_v23 = vrot.slane %v2477_v17, %v157_v13  ;;  %v242_v54 = vrot.slane %v2477_v17, %v241_v52  ;;  %v2532_v62 = vrot.slane %v2477_v17, %v651_v60 }
  0x2d   :  { %2135 = vmatprep.subr.mxu1 %v151_v7  ;;  %2125 = vmatpush3.msra.mxu0 %v60_v6  ;;  %p2387_p5 = pnand %p2386_p4, %p2380_p1 }
  0x2e   :  { %2126 = vmatprep.mubr.msk.f32.mxu0 %vm68_vm0, %v2451_v8  ;;  %2136 = vmatpush3.msra.mxu1 %v151_v7 }
  0x2f   :  { %2137 = vmatprep.mubr.msk.f32.mxu1 %vm68_vm0, %v2451_v8  ;;  %2127 = vmatmul.mubr.msk.f32.vlgmr.msra.gmra.mxu0 %vm68_vm0, %v2453_v9 }
  0x30   :  { %2138 = vmatmul.mubr.msk.f32.vlgmr.msra.gmra.mxu1 %vm68_vm0, %v2453_v9  ;;  %2148 = vmatprep.mubr.msk.f32.mxu0 %vm68_vm0, %v2451_v8 }
  0x31   :  { %2151 = vmatprep.subr.mxu1 %v2410_v15  ;;  %2153 = vmatprep.mubr.msk.f32.mxu1 %vm2411_vm1, %v2410_v15 }
  0x32   :  { %2140 = vmatprep.subr.mxu0 %v238_v32 }
  0x33   :  { %2141 = vmatpush3.msra.mxu0 %v238_v32 }
  0x34   :  { %2142 = vmatprep.subr.mxu0 %v237_v33 }
  0x35   :  { %2143 = vmatpush3.msra.mxu0 %v237_v33 }
  0x36   :  { %2144 = vmatprep.subr.mxu0 %v236_v34 }
  0x37   :  { %2145 = vmatpush3.msra.mxu0 %v236_v34 }
  0x38   :  { %2146 = vmatprep.subr.mxu0 %v235_v35 }
  0x39   :  { %2147 = vmatpush3.msra.mxu0 %v235_v35 }
  0x3a   :  { %2149 = vmatmul.mubr.msk.f32.vlgmr.msra.gmra.mxu0 %vm68_vm0, %v2453_v9  ;;  %2161 = vmatprep.subr.mxu0 %v2410_v15 }
  0x3b   :  { %2163 = vmatprep.mubr.msk.f32.mxu0 %vm2411_vm1, %v2410_v15 }
  0xef   :  { %v2128_v20 = vpop.f32.mrf.mxu0 }
  0xf0   :  { %v2139_v21 = vpop.f32.mrf.mxu1  ;;  %v2495_v29 = vadd.f32 %v2128_v20, %v67_v19 }
  0xf1   :  { %v141_v24 = vpop.f32.mrf.mxu0  ;;  %v2498_v30 = vadd.f32 %v2139_v21, %v158_v23 }
  0xf2   :  { %v225_v25 = vpop.f32.mrf.mxu1  ;;  %v2487_v26 = vadd.f32 %v141_v24, %v67_v19  ;;  %v323_v31 = vmul.f32 %v2484_v22, %v2495_v29  ;;  %v654_v3 = vmul.f32 %v2532_v62, %v2495_v29 }
  0xf3   :  { %v2489_v27 = vadd.f32 %v225_v25, %v158_v23 }
  0xf4   :  { %v322_v28 = vmul.f32 %v2484_v22, %v2487_v26  ;;  %v653_v1 = vmul.f32 %v2532_v62, %v2487_v26 }
  0xf5   :  { %2152 = vmatpush3.xpose.msk.msra.mxu1 %vm68_vm0, %v2489_v27 }
  0xf6   :  { %2156 = vmatprep.subr.mxu1 %v2410_v15 }
  0xf8   :  { %2154 = vmatmul.mubr.msk.f32.vlgmr.msra.gmra.mxu1 %vm68_vm0, %v322_v28 }
  0xf9   :  { %2157 = vmatpush3.xpose.msk.msra.mxu1 %vm68_vm0, %v2498_v30  ;;  %2158 = vmatprep.mubr.msk.f32.mxu1 %vm2411_vm1, %v2410_v15 }
  0xfa   :  { %2166 = vmatprep.subr.mxu1 %v2410_v15  ;;  %v2150_v53 = vpop.f32.mrf.mxu0 }
  0xfb   :  { %v2522_v56 = vadd.f32 %v2150_v53, %v242_v54 }
  0xfc   :  { %2159 = vmatmul.mubr.msk.f32.vlgmr.msra.gmra.mxu1 %vm68_vm0, %v323_v31  ;;  %v309_v55 = vpop.f32.mrf.mxu0 }
  0xfd   :  { %2168 = vmatprep.mubr.msk.f32.mxu1 %vm2411_vm1, %v2410_v15  ;;  %v2524_v57 = vadd.f32 %v309_v55, %v242_v54  ;;  %2167 = vmatpush3.msra.mxu1 %v2522_v56 }
  0xfe   :  { %2176 = vmatprep.subr.mxu1 %v2410_v15 }
  0xff   :  { %2162 = vmatpush3.msra.mxu0 %v2524_v57 }
 0x100   :  { %2171 = vmatprep.subr.mxu0 %v2410_v15 }
 0x1b8   :  { %v396_v36 = vpop.f32.mrf.mxu1 }
 0x1b9   :  { %v477_v37 = vsel %vm476_vm2, %v396_v36, -inf }
 0x1ba   :  { %478 = vmax.xlane.f32.xlu0 %v477_v37  ;;  %v2155_v38 = vpop.f32.mrf.mxu1 }
 0x1bc   :  { %v472_v39 = vpop.f32.mrf.mxu1 }
 0x1bd   :  { %v480_v40 = vsel %vm476_vm2, %v472_v39, -inf }
 0x1be   :  { %481 = vmax.xlane.f32.xlu0 %v480_v40  ;;  %v2160_v41 = vpop.f32.mrf.mxu1  ;;  %v2567_v40 = vrot.slane %v2467_v12, %v66_v16 }
 0x1c0   :  { %v978_v12 = vmul.f32 %v2567_v40, %v2495_v29 }
 0x243   :  { %v479_v42 = vpop.xlane.xlu0 %478 }
 0x244   :  { %v483_v43 = vsub.f32 %v396_v36, %v479_v42 }
 0x246   :  { %v485_v44 = vmul.f32 1.442695, %v483_v43  ;;  %v977_v43 = vmul.f32 %v2567_v40, %v2487_v26 }
 0x247   :  { %v482_v45 = vpop.xlane.xlu0 %481 }
 0x248   :  { %2283 = vpow2.f32 %v485_v44  ;;  %v484_v46 = vsub.f32 %v472_v39, %v482_v45 }
 0x24a   :  { %v487_v47 = vmul.f32 1.442695, %v484_v46 }
 0x24c   :  { %2285 = vpow2.f32 %v487_v47 }
 0x255   :  { %v2284_v48 = vpop.eup %2283 }
 0x256   :  { %v489_v49 = vsel %vm476_vm2, %v2284_v48, 0.0 }
 0x257   :  { %490 = vadd.xlane.f32.xlu1 %v489_v49 }
 0x259   :  { %v2286_v50 = vpop.eup %2285 }
 0x25a   :  { %v492_v51 = vsel %vm476_vm2, %v2286_v50, 0.0 }
 0x25b   :  { %493 = vadd.xlane.f32.xlu1 %v492_v51 }
 0x2e0   :  { %v491_v58 = vpop.xlane.xlu1 %490 }
 0x2e1   :  { %2287 = vrcp.f32 %v491_v58 }
 0x2e4   :  { %v494_v59 = vpop.xlane.xlu1 %493 }
 0x2e5   :  { %2289 = vrcp.f32 %v494_v59 }
 0x2ee   :  { %v2288_v61 = vpop.eup %2287 }
 0x2ef   :  { %v497_v63 = vmul.f32 %v2288_v61, %v2284_v48 }
 0x2f1   :  { %2164 = vmatmul.mubr.msk.f32.vlgmr.msra.gmra.mxu0 %vm476_vm2, %v497_v63 }
 0x2f2   :  { %v2290_v0 = vpop.eup %2289  ;;  %2172 = vmatpush3.xpose.msk.msra.mxu0 %vm68_vm0, %v2489_v27  ;;  %2173 = vmatprep.mubr.msk.f32.mxu0 %vm2411_vm1, %v2410_v15 }
 0x2f3   :  { %2181 = vmatprep.subr.mxu0 %v2410_v15  ;;  %v498_v2 = vmul.f32 %v2290_v0, %v2286_v50 }
 0x2f5   :  { %2169 = vmatmul.mubr.msk.f32.vlgmr.msra.gmra.mxu1 %vm476_vm2, %v498_v2  ;;  %2174 = vmatmul.mubr.msk.f32.vlgmr.msra.gmra.mxu0 %vm68_vm0, %v653_v1 }
 0x2f6   :  { %2177 = vmatpush3.xpose.msk.msra.mxu1 %vm68_vm0, %v2498_v30  ;;  %2182 = vmatpush3.msra.mxu0 %v2524_v57 }
 0x2f7   :  { %2178 = vmatprep.mubr.msk.f32.mxu1 %vm2411_vm1, %v2410_v15  ;;  %2186 = vmatprep.subr.mxu1 %v2410_v15 }
 0x2f8   :  { %2183 = vmatprep.mubr.msk.f32.mxu0 %vm2411_vm1, %v2410_v15  ;;  %2191 = vmatprep.subr.mxu0 %v2410_v15 }
 0x2f9   :  { %2179 = vmatmul.mubr.msk.f32.vlgmr.msra.gmra.mxu1 %vm68_vm0, %v654_v3 }
 0x2fa   :  { %2187 = vmatpush3.msra.mxu1 %v2522_v56  ;;  %2188 = vmatprep.mubr.msk.f32.mxu1 %vm2411_vm1, %v2410_v15 }
 0x2fb   :  { %2196 = vmatprep.subr.mxu1 %v2410_v15 }
 0x3b1   :  { %v568_v4 = vpop.f32.mrf.mxu0 }
 0x3b2   :  { %v645_v45 = vmul.f32 %v568_v4, %v2484_v22 }
 0x3b3   :  { %v2165_v5 = vpop.f32.mrf.mxu0 }
 0x3b5   :  { %v641_v6 = vpop.f32.mrf.mxu1  ;;  %v724_v7 = vpop.f32.mrf.mxu0 }
 0x3b6   :  { %v801_v10 = vsel %vm476_vm2, %v724_v7, -inf  ;;  %v646_v51 = vmul.f32 %v641_v6, %v2484_v22 }
 0x3b7   :  { %v2175_v13 = vpop.f32.mrf.mxu0  ;;  %802 = vmax.xlane.f32.xlu0 %v801_v10  ;;  %v2170_v18 = vpop.f32.mrf.mxu1 }
 0x3b9   :  { %v797_v19 = vpop.f32.mrf.mxu1 }
 0x3ba   :  { %v804_v20 = vsel %vm476_vm2, %v797_v19, -inf }
 0x3bb   :  { %805 = vmax.xlane.f32.xlu1 %v804_v20  ;;  %v2180_v21 = vpop.f32.mrf.mxu1  ;;  %v1301_v20 = vmul.f32 %v2471_v14, %v2487_v26  ;;  %v1302_v26 = vmul.f32 %v2471_v14, %v2495_v29 }
 0x440   :  { %v803_v23 = vpop.xlane.xlu0 %802 }
 0x441   :  { %v807_v24 = vsub.f32 %v724_v7, %v803_v23 }
 0x443   :  { %v809_v25 = vmul.f32 1.442695, %v807_v24 }
 0x444   :  { %v806_v28 = vpop.xlane.xlu1 %805 }
 0x445   :  { %2291 = vpow2.f32 %v809_v25  ;;  %v808_v31 = vsub.f32 %v797_v19, %v806_v28 }
 0x447   :  { %v811_v32 = vmul.f32 1.442695, %v808_v31 }
 0x449   :  { %2293 = vpow2.f32 %v811_v32 }
 0x452   :  { %v2292_v33 = vpop.eup %2291 }
 0x453   :  { %v813_v34 = vsel %vm476_vm2, %v2292_v33, 0.0 }
 0x454   :  { %814 = vadd.xlane.f32.xlu0 %v813_v34 }
 0x456   :  { %v2294_v35 = vpop.eup %2293 }
 0x457   :  { %v816_v36 = vsel %vm476_vm2, %v2294_v35, 0.0 }
 0x458   :  { %817 = vadd.xlane.f32.xlu1 %v816_v36 }
 0x4dd   :  { %v815_v37 = vpop.xlane.xlu0 %814 }
 0x4de   :  { %2295 = vrcp.f32 %v815_v37 }
 0x4e1   :  { %v818_v38 = vpop.xlane.xlu1 %817 }
 0x4e2   :  { %2297 = vrcp.f32 %v818_v38 }
 0x4eb   :  { %v2296_v39 = vpop.eup %2295 }
 0x4ec   :  { %v821_v41 = vmul.f32 %v2296_v39, %v2292_v33 }
 0x4ee   :  { %2184 = vmatmul.mubr.msk.f32.vlgmr.msra.gmra.mxu0 %vm476_vm2, %v821_v41 }
 0x4ef   :  { %v2298_v42 = vpop.eup %2297  ;;  %2192 = vmatpush3.xpose.msk.msra.mxu0 %vm68_vm0, %v2489_v27  ;;  %2193 = vmatprep.mubr.msk.f32.mxu0 %vm2411_vm1, %v2410_v15 }
 0x4f0   :  { %2201 = vmatprep.subr.mxu0 %v2410_v15  ;;  %v822_v44 = vmul.f32 %v2298_v42, %v2294_v35 }
 0x4f2   :  { %2189 = vmatmul.mubr.msk.f32.vlgmr.msra.gmra.mxu1 %vm476_vm2, %v822_v44  ;;  %2194 = vmatmul.mubr.msk.f32.vlgmr.msra.gmra.mxu0 %vm68_vm0, %v977_v43 }
 0x4f3   :  { %2197 = vmatpush3.xpose.msk.msra.mxu1 %vm68_vm0, %v2498_v30  ;;  %2202 = vmatpush3.msra.mxu0 %v2524_v57 }
 0x4f4   :  { %2198 = vmatprep.mubr.msk.f32.mxu1 %vm2411_vm1, %v2410_v15  ;;  %2206 = vmatprep.subr.mxu1 %v2410_v15 }
 0x4f5   :  { %2203 = vmatprep.mubr.msk.f32.mxu0 %vm2411_vm1, %v2410_v15  ;;  %2211 = vmatprep.subr.mxu0 %v2410_v15 }
 0x4f6   :  { %2199 = vmatmul.mubr.msk.f32.vlgmr.msra.gmra.mxu1 %vm68_vm0, %v978_v12 }
 0x4f7   :  { %2207 = vmatpush3.msra.mxu1 %v2522_v56  ;;  %2208 = vmatprep.mubr.msk.f32.mxu1 %vm2411_vm1, %v2410_v15 }
 0x4f8   :  { %2216 = vmatprep.subr.mxu1 %v2410_v15 }
 0x5ae   :  { %v892_v16 = vpop.f32.mrf.mxu0 }
 0x5af   :  { %v969_v46 = vmul.f32 %v892_v16, %v2532_v62 }
 0x5b0   :  { %v2185_v47 = vpop.f32.mrf.mxu0 }
 0x5b1   :  { %v971_v48 = vadd.f32 %v969_v46, %v645_v45 }
 0x5b2   :  { %v965_v49 = vpop.f32.mrf.mxu1  ;;  %v1048_v50 = vpop.f32.mrf.mxu0 }
 0x5b3   :  { %v970_v52 = vmul.f32 %v965_v49, %v2532_v62  ;;  %v1125_v53 = vsel %vm476_vm2, %v1048_v50, -inf  ;;  %v1625_v49 = vld [vmem:[#allocation5 + $0x78] sm:$0xff] }
 0x5b4   :  { %1126 = vmax.xlane.f32.xlu0 %v1125_v53  ;;  %v2190_v54 = vpop.f32.mrf.mxu1  ;;  %v2195_v55 = vpop.f32.mrf.mxu0  ;;  %v1715_v53 = vld [vmem:[#allocation5 + $0x98] sm:$0xff] }
 0x5b5   :  { %v972_v58 = vadd.f32 %v970_v52, %v646_v51  ;;  %v1623_v51 = vld [vmem:[#allocation5 + $0x68] sm:$0xff]  ;;  %v1622_v52 = vld [vmem:[#allocation5 + $0x60] sm:$0xff] }
 0x5b6   :  { %v1121_v59 = vpop.f32.mrf.mxu1 }
 0x5b7   :  { %v1128_v60 = vsel %vm476_vm2, %v1121_v59, -inf }
 0x5b8   :  { %1129 = vmax.xlane.f32.xlu1 %v1128_v60  ;;  %v2200_v61 = vpop.f32.mrf.mxu1 }
 0x63d   :  { %v1127_v63 = vpop.xlane.xlu0 %1126 }
 0x63e   :  { %v1131_v0 = vsub.f32 %v1048_v50, %v1127_v63  ;;  %v1624_v50 = vld [vmem:[#allocation5 + $0x70] sm:$0xff] }
 0x640   :  { %v1133_v1 = vmul.f32 1.442695, %v1131_v0 }
 0x641   :  { %v1130_v2 = vpop.xlane.xlu1 %1129 }
 0x642   :  { %2299 = vpow2.f32 %v1133_v1  ;;  %v1132_v3 = vsub.f32 %v1121_v59, %v1130_v2  ;;  %v1714_v1 = vld [vmem:[#allocation5 + $0x90] sm:$0xff]  ;;  %v1713_v2 = vld [vmem:[#allocation5 + $0x88] sm:$0xff] }
 0x644   :  { %v1135_v22 = vmul.f32 1.442695, %v1132_v3  ;;  %v1712_v3 = vld [vmem:[#allocation5 + $0x80] sm:$0xff] }
 0x646   :  { %2301 = vpow2.f32 %v1135_v22 }
 0x64f   :  { %v2300_v62 = vpop.eup %2299 }
 0x650   :  { %v1137_v4 = vsel %vm476_vm2, %v2300_v62, 0.0 }
 0x651   :  { %1138 = vadd.xlane.f32.xlu0 %v1137_v4 }
 0x653   :  { %v2302_v5 = vpop.eup %2301 }
 0x654   :  { %v1140_v6 = vsel %vm476_vm2, %v2302_v5, 0.0 }
 0x655   :  { %1141 = vadd.xlane.f32.xlu1 %v1140_v6 }
 0x6da   :  { %v1139_v7 = vpop.xlane.xlu0 %1138 }
 0x6db   :  { %2303 = vrcp.f32 %v1139_v7 }
 0x6de   :  { %v1142_v10 = vpop.xlane.xlu1 %1141 }
 0x6df   :  { %2305 = vrcp.f32 %v1142_v10 }
 0x6e8   :  { %v2304_v13 = vpop.eup %2303 }
 0x6e9   :  { %v1145_v18 = vmul.f32 %v2304_v13, %v2300_v62 }
 0x6eb   :  { %2204 = vmatmul.mubr.msk.f32.vlgmr.msra.gmra.mxu0 %vm476_vm2, %v1145_v18 }
 0x6ec   :  { %v2306_v19 = vpop.eup %2305  ;;  %2212 = vmatpush3.xpose.msk.msra.mxu0 %vm68_vm0, %v2489_v27  ;;  %2213 = vmatprep.mubr.msk.f32.mxu0 %vm2411_vm1, %v2410_v15 }
 0x6ed   :  { %2221 = vmatprep.subr.mxu0 %v2410_v15  ;;  %v1146_v21 = vmul.f32 %v2306_v19, %v2302_v5 }
 0x6ef   :  { %2209 = vmatmul.mubr.msk.f32.vlgmr.msra.gmra.mxu1 %vm476_vm2, %v1146_v21  ;;  %2214 = vmatmul.mubr.msk.f32.vlgmr.msra.gmra.mxu0 %vm68_vm0, %v1301_v20  ;;  %v1904_v21 = vld [vmem:[#allocation5 + $0xb8] sm:$0xff] }
 0x6f0   :  { %2217 = vmatpush3.xpose.msk.msra.mxu1 %vm68_vm0, %v2498_v30  ;;  %2222 = vmatpush3.msra.mxu0 %v2524_v57 }
 0x6f1   :  { %2218 = vmatprep.mubr.msk.f32.mxu1 %vm2411_vm1, %v2410_v15  ;;  %2226 = vmatprep.subr.mxu1 %v2410_v15 }
 0x6f2   :  { %2223 = vmatprep.mubr.msk.f32.mxu0 %vm2411_vm1, %v2410_v15  ;;  %2231 = vmatprep.subr.mxu0 %v1625_v49 }
 0x6f3   :  { %2219 = vmatmul.mubr.msk.f32.vlgmr.msra.gmra.mxu1 %vm68_vm0, %v1302_v26  ;;  %v1903_v26 = vld [vmem:[#allocation5 + $0xb0] sm:$0xff] }
 0x6f4   :  { %2227 = vmatpush3.msra.mxu1 %v2522_v56  ;;  %2228 = vmatprep.mubr.msk.f32.mxu1 %vm2411_vm1, %v2410_v15 }
 0x6f5   :  { %2242 = vmatprep.subr.mxu1 %v1715_v53 }
 0x7ab   :  { %v1216_v27 = vpop.f32.mrf.mxu0 }
 0x7ac   :  { %v1293_v30 = vmul.f32 %v1216_v27, %v2567_v40  ;;  %v1902_v27 = vld [vmem:[#allocation5 + $0xa8] sm:$0xff] }
 0x7ad   :  { %v2205_v57 = vpop.f32.mrf.mxu0 }
 0x7ae   :  { %v1295_v23 = vadd.f32 %v1293_v30, %v971_v48  ;;  %v1901_v30 = vld [vmem:[#allocation5 + $0xa0] sm:$0xff] }
 0x7af   :  { %v1289_v24 = vpop.f32.mrf.mxu1  ;;  %v1372_v25 = vpop.f32.mrf.mxu0 }
 0x7b0   :  { %v1294_v28 = vmul.f32 %v1289_v24, %v2567_v40  ;;  %v1449_v29 = vsel %vm476_vm2, %v1372_v25, -inf }
 0x7b1   :  { %1450 = vmax.xlane.f32.xlu0 %v1449_v29  ;;  %v2210_v31 = vpop.f32.mrf.mxu1  ;;  %v2215_v32 = vpop.f32.mrf.mxu0  ;;  %v1894_v29 = vsub.s32 5, %v2465_v11 }
 0x7b2   :  { %v1296_v33 = vadd.f32 %v1294_v28, %v972_v58  ;;  %v1888_v28 = vsub.s32 4, %v2465_v11 }
 0x7b3   :  { %v1445_v34 = vpop.f32.mrf.mxu1 }
 0x7b4   :  { %v1452_v56 = vsel %vm476_vm2, %v1445_v34, -inf  ;;  %v1889_v31 = vrot.slane %v2477_v17, %v1888_v28 }
 0x7b5   :  { %1453 = vmax.xlane.f32.xlu1 %v1452_v56  ;;  %v2220_v15 = vpop.f32.mrf.mxu1  ;;  %v1895_v56 = vrot.slane %v2477_v17, %v1894_v29 }
 0x83a   :  { %v1451_v35 = vpop.xlane.xlu0 %1450 }
 0x83b   :  { %v1455_v36 = vsub.f32 %v1372_v25, %v1451_v35 }
 0x83d   :  { %v1457_v37 = vmul.f32 1.442695, %v1455_v36 }
 0x83e   :  { %v1454_v38 = vpop.xlane.xlu1 %1453 }
 0x83f   :  { %2307 = vpow2.f32 %v1457_v37  ;;  %v1456_v39 = vsub.f32 %v1445_v34, %v1454_v38 }
 0x841   :  { %v1459_v41 = vmul.f32 1.442695, %v1456_v39 }
 0x843   :  { %2309 = vpow2.f32 %v1459_v41 }
 0x84c   :  { %v2308_v40 = vpop.eup %2307 }
 0x84d   :  { %v1461_v42 = vsel %vm476_vm2, %v2308_v40, 0.0 }
 0x84e   :  { %1462 = vadd.xlane.f32.xlu0 %v1461_v42 }
 0x850   :  { %v2310_v43 = vpop.eup %2309 }
 0x851   :  { %v1464_v44 = vsel %vm476_vm2, %v2310_v43, 0.0 }
 0x852   :  { %1465 = vadd.xlane.f32.xlu1 %v1464_v44 }
 0x8d7   :  { %v1463_v12 = vpop.xlane.xlu0 %1462 }
 0x8d8   :  { %2311 = vrcp.f32 %v1463_v12 }
 0x8db   :  { %v1466_v16 = vpop.xlane.xlu1 %1465 }
 0x8dc   :  { %2313 = vrcp.f32 %v1466_v16 }
 0x8e5   :  { %v2312_v45 = vpop.eup %2311 }
 0x8e6   :  { %v1469_v46 = vmul.f32 %v2312_v45, %v2308_v40 }
 0x8e8   :  { %2224 = vmatmul.mubr.msk.f32.vlgmr.msra.gmra.mxu0 %vm476_vm2, %v1469_v46 }
 0x8e9   :  { %v2314_v47 = vpop.eup %2313  ;;  %2232 = vmatpush3.msra.mxu0 %v1625_v49 }
 0x8ea   :  { %v1470_v48 = vmul.f32 %v2314_v47, %v2310_v43  ;;  %2233 = vmatprep.subr.mxu0 %v1624_v50 }
 0x8eb   :  { %2234 = vmatpush3.msra.mxu0 %v1624_v50 }
 0x8ec   :  { %2229 = vmatmul.mubr.msk.f32.vlgmr.msra.gmra.mxu1 %vm476_vm2, %v1470_v48  ;;  %2235 = vmatprep.subr.mxu0 %v1623_v51 }
 0x8ed   :  { %2236 = vmatpush3.msra.mxu0 %v1623_v51  ;;  %2243 = vmatpush3.msra.mxu1 %v1715_v53 }
 0x8ee   :  { %2237 = vmatprep.subr.mxu0 %v1622_v52  ;;  %2244 = vmatprep.subr.mxu1 %v1714_v1 }
 0x8ef   :  { %2238 = vmatpush3.msra.mxu0 %v1622_v52  ;;  %2245 = vmatpush3.msra.mxu1 %v1714_v1 }
 0x8f0   :  { %2253 = vmatprep.subr.mxu0 %v1715_v53  ;;  %2246 = vmatprep.subr.mxu1 %v1713_v2 }
 0x8f1   :  { %2247 = vmatpush3.msra.mxu1 %v1713_v2 }
 0x8f2   :  { %2248 = vmatprep.subr.mxu1 %v1712_v3 }
 0x8f3   :  { %2249 = vmatpush3.msra.mxu1 %v1712_v3 }
 0x8f4   :  { %2264 = vmatprep.subr.mxu1 %v1904_v21 }
 0x9a8   :  { %v1540_v54 = vpop.f32.mrf.mxu0 }
 0x9a9   :  { %v1617_v55 = vmul.f32 %v1540_v54, %v2471_v14 }
 0x9aa   :  { %v2225_v58 = vpop.f32.mrf.mxu0 }
 0x9ab   :  { %v1619_v59 = vadd.f32 %v1617_v55, %v1295_v23 }
 0x9ac   :  { %v1613_v60 = vpop.f32.mrf.mxu1 }
 0x9ad   :  { %v1618_v61 = vmul.f32 %v1613_v60, %v2471_v14  ;;  %2239 = vmatprep.mubr.msk.f32.mxu0 %vm68_vm0, %v1619_v59  ;;  %v1628_v14 = vsub.s32 3, %v2465_v11 }
 0x9ae   :  { %v2230_v63 = vpop.f32.mrf.mxu1 }
 0x9af   :  { %v1620_v0 = vadd.f32 %v1618_v61, %v1296_v33  ;;  %v1629_v22 = vrot.slane %v2477_v17, %v1628_v14 }
 0x9b1   :  { %2240 = vmatmul.mubr.msk.f32.vlgmr.msra.gmra.mxu0 %vm68_vm0, %v1620_v0 }
 0x9b2   :  { %2254 = vmatpush3.msra.mxu0 %v1715_v53 }
 0x9b3   :  { %2255 = vmatprep.subr.mxu0 %v1714_v1 }
 0x9b4   :  { %2256 = vmatpush3.msra.mxu0 %v1714_v1 }
 0x9b5   :  { %2257 = vmatprep.subr.mxu0 %v1713_v2 }
 0x9b6   :  { %2258 = vmatpush3.msra.mxu0 %v1713_v2 }
 0x9b7   :  { %2259 = vmatprep.subr.mxu0 %v1712_v3 }
 0x9b8   :  { %2260 = vmatpush3.msra.mxu0 %v1712_v3 }
 0xa71   :  { %v2241_v62 = vpop.f32.mrf.mxu0 }
 0xa72   :  { %v1708_v6 = vadd.f32 %v2241_v62, %v1629_v22 }
 0xa73   :  { %v1702_v4 = vpop.f32.mrf.mxu0 }
 0xa74   :  { %v1703_v5 = vadd.f32 %v1702_v4, %v1629_v22 }
 0xa76   :  { %2250 = vmatprep.mubr.msk.f32.mxu1 %vm68_vm0, %v1703_v5 }
 0xa77   :  { %2251 = vmatmul.mubr.msk.f32.vlgmr.msra.gmra.mxu1 %vm68_vm0, %v1708_v6 }
 0xa78   :  { %2265 = vmatpush3.msra.mxu1 %v1904_v21 }
 0xa79   :  { %2266 = vmatprep.subr.mxu1 %v1903_v26 }
 0xa7a   :  { %2267 = vmatpush3.msra.mxu1 %v1903_v26 }
 0xa7b   :  { %2268 = vmatprep.subr.mxu1 %v1902_v27 }
 0xa7c   :  { %2269 = vmatpush3.msra.mxu1 %v1902_v27 }
 0xa7d   :  { %2270 = vmatprep.subr.mxu1 %v1901_v30 }
 0xa7e   :  { %2271 = vmatpush3.msra.mxu1 %v1901_v30 }
 0xb37   :  { %v2252_v7 = vpop.f32.mrf.mxu1 }
 0xb38   :  { %v1798_v10 = vsub.f32 %v1708_v6, %v2252_v7 }
 0xb39   :  { %v1788_v13 = vpop.f32.mrf.mxu1 }
 0xb3a   :  { %v1797_v18 = vsub.f32 %v1703_v5, %v1788_v13  ;;  %v1800_v20 = vmul.f32 %v1798_v10, %v1798_v10 }
 0xb3c   :  { %v1799_v19 = vmul.f32 %v1797_v18, %v1797_v18 }
 0xb3e   :  { %2261 = vmatprep.mubr.msk.f32.mxu0 %vm68_vm0, %v1799_v19 }
 0xb3f   :  { %2262 = vmatmul.mubr.msk.f32.vlgmr.msra.gmra.mxu0 %vm68_vm0, %v1800_v20 }
 0xbff   :  { %v2263_v57 = vpop.f32.mrf.mxu0 }
 0xc00   :  { %v1879_v23 = vadd.f32 1e-05, %v2263_v57 }
 0xc01   :  { %v1873_v24 = vpop.f32.mrf.mxu0 }
 0xc02   :  { %2315 = vrsqrt.f32 %v1879_v23  ;;  %v1874_v25 = vadd.f32 1e-05, %v1873_v24 }
 0xc04   :  { %2317 = vrsqrt.f32 %v1874_v25 }
 0xc0f   :  { %v2316_v32 = vpop.eup %2315 }
 0xc10   :  { %v1885_v33 = vmul.f32 %v2316_v32, %v1798_v10 }
 0xc11   :  { %v2318_v34 = vpop.eup %2317 }
 0xc12   :  { %v1884_v15 = vmul.f32 %v2318_v34, %v1797_v18  ;;  %v1891_v35 = vmul.f32 %v1889_v31, %v1885_v33 }
 0xc14   :  { %v1890_v36 = vmul.f32 %v1889_v31, %v1884_v15  ;;  %v1897_v37 = vadd.f32 %v1895_v56, %v1891_v35 }
 0xc16   :  { %v1896_v38 = vadd.f32 %v1895_v56, %v1890_v36  ;;  %v1899_v41 = vadd.f32 %v1897_v37, %v2453_v9 }
 0xc18   :  { %v1898_v39 = vadd.f32 %v1896_v38, %v2451_v8 }
 0xc1a   :  { %2272 = vmatprep.mubr.msk.f32.mxu1 %vm68_vm0, %v1898_v39 }
 0xc1b   :  { %2273 = vmatmul.mubr.msk.f32.vlgmr.msra.gmra.mxu1 %vm68_vm0, %v1899_v41 }
 0xcdb   :  { %v2274_v11 = vpop.f32.mrf.mxu1 }
 0xcdc   :  { %1987 = vst.msk [vmem:[#allocation8 + $0x8] sm:$0xff] %vm68_vm0, %v2274_v11 }
 0xcdd   :  { %v1977_v17 = vpop.f32.mrf.mxu1 }
 0xcde   :  { %1986 = vst.msk [vmem:[#allocation8] sm:$0xff] %vm68_vm0, %v1977_v17 }
 0xcdf   :  { %2390 = shalt.err (!%p2387_p5)
}
 0xce0   :  { %1999 = dma.vmem_to_hbm [thread:$0]  %s1994_s2, 256, %s2664_s3, [#allocation4], %s2407_s17, %s2407_s17, %s2408_s18  }
 0xce1   :  { %2403 = dma.done.wait [#allocation4], 256  }
 0xce2   :  { %2404 = vsyncadd [#allocation4], 4294967040 }
 0xce3   :  { %2003 = vsyncpa [#allocation3], 1 }
 0xce4   :  { %2004 = vsyncpa [#allocation6], 1 }
 0xce5   :  { %2005 = vsyncpa [#allocation4], 1 }

</bundles_post_ra>
